<compile_context>
chip_gen: v7x
topology: tpu7x:2x2x1
jax: 0.10.0
libtpu: 0.0.40
codegen_flags: <defaults>
</compile_context>

<pallas_src>
import math

import jax
import jax.numpy as jnp
from jax.experimental import pallas as pl
from jax.experimental.pallas import tpu as pltpu

# ---------------- model dims (small, consistent with the module) ----------------
B = 2            # batch
T = 8            # sequence length
C = 32           # n_embd
NH = 4           # n_head
HD = C // NH     # head dim
BT = B * T
EPS = 1e-5
NEG_INF = -1e30


def _layernorm(h, w, b):
    mu = jnp.mean(h, axis=-1, keepdims=True)
    var = jnp.mean((h - mu) ** 2, axis=-1, keepdims=True)
    return (h - mu) * jax.lax.rsqrt(var + EPS) * w + b


def block_kernel(x_ref,
                 ln1w_ref, ln1b_ref,
                 wqkv_ref, bqkv_ref,
                 wpr_ref, bpr_ref,
                 ln2w_ref, ln2b_ref,
                 wfc_ref, bfc_ref,
                 wp2_ref, bp2_ref,
                 o_ref):
    """One grid step == one batch element: x_ref is the (T, C) slab for it."""
    x = x_ref[...]                                            # (T, C) fp32

    # ---- ln_1 ----
    h = _layernorm(x, ln1w_ref[0], ln1b_ref[0])               # (T, C)

    # ---- fused QKV projection: ONE MXU matmul, 3C-lane output ----
    # (1/sqrt(HD) softmax scale already folded into the Q slice wrapper-side.)
    qkv = jnp.dot(h, wqkv_ref[...],
                  preferred_element_type=jnp.float32) + bqkv_ref[0]   # (T, 3C)

    # ---- causal mask built in-kernel (no HBM mask input) ----
    row = jax.lax.broadcasted_iota(jnp.int32, (T, T), 0)
    col = jax.lax.broadcasted_iota(jnp.int32, (T, T), 1)
    causal = col <= row                                        # (T, T) bool

    # ---- attention: per-head (T, T) scores; batch never enters the scores ----
    # NH=4 static unroll over lane slices of the fused QKV output.  At real GPT
    # dims this section becomes a flash-style (q-tile x kv-tile) grid instead
    # of materializing (NH, T, T) scores.
    y_heads = []
    for hh in range(NH):
        qh = qkv[:, 0 * C + hh * HD: 0 * C + (hh + 1) * HD]    # (T, HD)
        kh = qkv[:, 1 * C + hh * HD: 1 * C + (hh + 1) * HD]
        vh = qkv[:, 2 * C + hh * HD: 2 * C + (hh + 1) * HD]
        s = jnp.einsum('td,sd->ts', qh, kh,
                       preferred_element_type=jnp.float32)     # (T, T)
        s = jnp.where(causal, s, NEG_INF)
        m = jnp.max(s, axis=-1, keepdims=True)
        e = jnp.exp(s - m)
        l = jnp.sum(e, axis=-1, keepdims=True)
        p = e * pl.reciprocal(l, approx=True)                  # EUP divide
        y_heads.append(jnp.dot(p, vh,
                               preferred_element_type=jnp.float32))   # (T, HD)

    # ---- c_proj with the head-sum fused into the MXU contraction ----
    y = jnp.concatenate(y_heads, axis=-1)                      # (T, C)
    attn_out = jnp.dot(y, wpr_ref[...],
                       preferred_element_type=jnp.float32) + bpr_ref[0]
    x1 = x + attn_out                                          # residual (dropout p=0)

    # ---- ln_2 + MLP (exact erf GELU, matches PyTorch F.gelu default) ----
    h2 = _layernorm(x1, ln2w_ref[0], ln2b_ref[0])
    f = jnp.dot(h2, wfc_ref[...], preferred_element_type=jnp.float32) + bfc_ref[0]
    g = 0.5 * f * (1.0 + jax.lax.erf(f * (1.0 / math.sqrt(2.0))))
    mlp_out = jnp.dot(g, wp2_ref[...], preferred_element_type=jnp.float32) + bp2_ref[0]

    o_ref[...] = (x1 + mlp_out).astype(o_ref.dtype)


# ---------------- one-time weight prep (hoisted out of the call path) ----------------
def prep_params(params):
    """Fold the 1/sqrt(HD) softmax scale into the Q slice of the fused QKV
    weight/bias.  In a real model this runs once at weight-load time."""
    (ln1w, ln1b, wqkv, bqkv, wpr, bpr, ln2w, ln2b, wfc, bfc, wp2, bp2) = params
    scale = 1.0 / math.sqrt(HD)
    wqkv = wqkv.at[:, :C].multiply(scale)
    bqkv = bqkv.at[:, :C].multiply(scale)
    return (ln1w, ln1b, wqkv, bqkv, wpr, bpr, ln2w, ln2b, wfc, bfc, wp2, bp2)


@jax.jit
def gpt_block(x, prepped_params):
    (ln1w, ln1b, wqkv, bqkv, wpr, bpr, ln2w, ln2b, wfc, bfc, wp2, bp2) = prepped_params
    x2d = x.reshape(BT, C)     # flatten batch into rows; the grid picks per-batch slabs

    weight_args = (ln1w, ln1b, wqkv, bqkv, wpr, bpr, ln2w, ln2b, wfc, bfc, wp2, bp2)

    def invariant_spec(a):
        # Grid-invariant operand: full block, same block index every step.
        # (At real dims: pipeline_mode=pl.Buffered(1) to drop the unused
        #  second buffer; negligible here.)
        return pl.BlockSpec(a.shape, lambda b: (0, 0))

    in_specs = [pl.BlockSpec((T, C), lambda b: (b, 0))] \
             + [invariant_spec(a) for a in weight_args]

    out2d = pl.pallas_call(
        block_kernel,
        out_shape=jax.ShapeDtypeStruct((BT, C), x.dtype),
        grid_spec=pltpu.PrefetchScalarGridSpec(
            num_scalar_prefetch=0,
            grid=(B,),                                   # one block per batch element
            in_specs=in_specs,
            out_specs=pl.BlockSpec((T, C), lambda b: (b, 0)),
        ),
        compiler_params=pltpu.CompilerParams(
            # batch axis is embarrassingly parallel -> v7x can split it over
            # its 2 TensorCores; neutral on single-TC v5e/v6e.
            dimension_semantics=("parallel",)),
    )(x2d, *weight_args)
    return out2d.reshape(B, T, C)


# ---------------- pure-JAX reference (PyTorch fp32 semantics) ----------------
def ref_block(x, params):
    (ln1w, ln1b, wqkv, bqkv, wpr, bpr, ln2w, ln2b, wfc, bfc, wp2, bp2) = params

    def ln(h, w, b):
        mu = jnp.mean(h, axis=-1, keepdims=True)
        var = jnp.mean((h - mu) ** 2, axis=-1, keepdims=True)
        return (h - mu) / jnp.sqrt(var + EPS) * w[0] + b[0]

    h = ln(x, ln1w, ln1b)
    qkv = h @ wqkv + bqkv[0]
    q, k, v = jnp.split(qkv, 3, axis=-1)

    def heads(a):  # (B,T,C) -> (B,NH,T,HD)
        return a.reshape(B, T, NH, HD).transpose(0, 2, 1, 3)

    q, k, v = heads(q), heads(k), heads(v)
    s = jnp.einsum("bhtd,bhsd->bhts", q, k) / math.sqrt(HD)
    mask = jnp.tril(jnp.ones((T, T), bool))
    s = jnp.where(mask, s, NEG_INF)
    p = jax.nn.softmax(s, axis=-1)
    y = jnp.einsum("bhts,bhsd->bhtd", p, v).transpose(0, 2, 1, 3).reshape(B, T, C)
    x1 = y @ wpr + bpr[0] + x
    h2 = ln(x1, ln2w, ln2b)
    f = h2 @ wfc + bfc[0]
    g = 0.5 * f * (1.0 + jax.lax.erf(f / math.sqrt(2.0)))
    return g @ wp2 + bp2[0] + x1


def init_params(key):
    ks = jax.random.split(key, 8)
    w = lambda k, shape: (0.02 * jax.random.normal(k, shape)).astype(jnp.float32)
    b = lambda k, n: (0.01 * jax.random.normal(k, (1, n))).astype(jnp.float32)
    ln1w = jnp.ones((1, C), jnp.float32)
    ln1b = jnp.zeros((1, C), jnp.float32)
    ln2w = jnp.ones((1, C), jnp.float32)
    ln2b = jnp.zeros((1, C), jnp.float32)
    wqkv = w(ks[0], (C, 3 * C)); bqkv = b(ks[1], 3 * C)
    wpr = w(ks[2], (C, C));      bpr = b(ks[3], C)
    wfc = w(ks[4], (C, 4 * C));  bfc = b(ks[5], 4 * C)
    wp2 = w(ks[6], (4 * C, C));  bp2 = b(ks[7], C)
    return (ln1w, ln1b, wqkv, bqkv, wpr, bpr, ln2w, ln2b, wfc, bfc, wp2, bp2)


if __name__ == "__main__":
    key = jax.random.PRNGKey(0)
    kx, kp = jax.random.split(key)
    x = jax.random.normal(kx, (B, T, C), dtype=jnp.float32)
    params = init_params(kp)
    prepped = prep_params(params)          # one-time prep, outside the jitted call

    out = jax.block_until_ready(gpt_block(x, prepped))

    ref = jax.block_until_ready(ref_block(x, params))
    assert out.shape == (B, T, C)
    # Tolerance 1e-3 for the EUP approximate reciprocal in the softmax
    # normalization; everything else is exact fp32.
    assert jnp.allclose(out, ref, atol=1e-3, rtol=1e-3), float(jnp.max(jnp.abs(out - ref)))
    print("KERNEL_OK")
</pallas_src>

<mosaic_0001>
module attributes {stable_mosaic.version = 11 : i64} {
  func.func @block_kernel(%arg0: i32, %arg1: memref<8x32xf32, #tpu.memory_space<vmem>>, %arg2: memref<1x32xf32, #tpu.memory_space<vmem>>, %arg3: memref<1x32xf32, #tpu.memory_space<vmem>>, %arg4: memref<32x96xf32, #tpu.memory_space<vmem>>, %arg5: memref<1x96xf32, #tpu.memory_space<vmem>>, %arg6: memref<32x32xf32, #tpu.memory_space<vmem>>, %arg7: memref<1x32xf32, #tpu.memory_space<vmem>>, %arg8: memref<1x32xf32, #tpu.memory_space<vmem>>, %arg9: memref<1x32xf32, #tpu.memory_space<vmem>>, %arg10: memref<32x128xf32, #tpu.memory_space<vmem>>, %arg11: memref<1x128xf32, #tpu.memory_space<vmem>>, %arg12: memref<128x32xf32, #tpu.memory_space<vmem>>, %arg13: memref<1x32xf32, #tpu.memory_space<vmem>>, %arg14: memref<8x32xf32, #tpu.memory_space<vmem>>) attributes {dimension_semantics = [#tpu.dimension_semantics<parallel>], iteration_bounds = array<i64: 2>, scalar_prefetch = 0 : i64, scratch_operands = 0 : i64, tpu.core_type = #tpu.core_type<tc>, window_params = [{transform_indices = @transform_0, window_bounds = array<i64: 8, 32>}, {pipeline_mode = #tpu.pipeline_mode<synchronous>, transform_indices = @transform_1, window_bounds = array<i64: 1, 32>}, {pipeline_mode = #tpu.pipeline_mode<synchronous>, transform_indices = @transform_2, window_bounds = array<i64: 1, 32>}, {pipeline_mode = #tpu.pipeline_mode<synchronous>, transform_indices = @transform_3, window_bounds = array<i64: 32, 96>}, {pipeline_mode = #tpu.pipeline_mode<synchronous>, transform_indices = @transform_4, window_bounds = array<i64: 1, 96>}, {pipeline_mode = #tpu.pipeline_mode<synchronous>, transform_indices = @transform_5, window_bounds = array<i64: 32, 32>}, {pipeline_mode = #tpu.pipeline_mode<synchronous>, transform_indices = @transform_6, window_bounds = array<i64: 1, 32>}, {pipeline_mode = #tpu.pipeline_mode<synchronous>, transform_indices = @transform_7, window_bounds = array<i64: 1, 32>}, {pipeline_mode = #tpu.pipeline_mode<synchronous>, transform_indices = @transform_8, window_bounds = array<i64: 1, 32>}, {pipeline_mode = #tpu.pipeline_mode<synchronous>, transform_indices = @transform_9, window_bounds = array<i64: 32, 128>}, {pipeline_mode = #tpu.pipeline_mode<synchronous>, transform_indices = @transform_10, window_bounds = array<i64: 1, 128>}, {pipeline_mode = #tpu.pipeline_mode<synchronous>, transform_indices = @transform_11, window_bounds = array<i64: 128, 32>}, {pipeline_mode = #tpu.pipeline_mode<synchronous>, transform_indices = @transform_12, window_bounds = array<i64: 1, 32>}, {transform_indices = @transform_13, window_bounds = array<i64: 8, 32>}]} {
    %c0 = arith.constant 0 : index
    %c0_0 = arith.constant 0 : index
    %0 = vector.load %arg1[%c0, %c0_0] : memref<8x32xf32, #tpu.memory_space<vmem>>, vector<8x32xf32>
    %c0_1 = arith.constant 0 : index
    %c0_2 = arith.constant 0 : index
    %1 = vector.load %arg2[%c0_1, %c0_2] : memref<1x32xf32, #tpu.memory_space<vmem>>, vector<1x32xf32>
    %2 = vector.shape_cast %1 : vector<1x32xf32> to vector<32xf32>
    %c0_3 = arith.constant 0 : index
    %c0_4 = arith.constant 0 : index
    %3 = vector.load %arg3[%c0_3, %c0_4] : memref<1x32xf32, #tpu.memory_space<vmem>>, vector<1x32xf32>
    %4 = vector.shape_cast %3 : vector<1x32xf32> to vector<32xf32>
    %cst = arith.constant dense<0.000000e+00> : vector<8xf32>
    %5 = vector.multi_reduction <add>, %0, %cst [1] : vector<8x32xf32> to vector<8xf32>
    %6 = vector.shape_cast %5 : vector<8xf32> to vector<8x1xf32>
    %cst_5 = arith.constant 3.200000e+01 : f32
    %7 = vector.broadcast %cst_5 : f32 to vector<8x1xf32>
    %8 = arith.divf %6, %7 : vector<8x1xf32>
    %9 = vector.broadcast %8 : vector<8x1xf32> to vector<8x32xf32>
    %10 = arith.subf %0, %9 : vector<8x32xf32>
    %11 = arith.mulf %10, %10 : vector<8x32xf32>
    %cst_6 = arith.constant dense<0.000000e+00> : vector<8xf32>
    %12 = vector.multi_reduction <add>, %11, %cst_6 [1] : vector<8x32xf32> to vector<8xf32>
    %13 = vector.shape_cast %12 : vector<8xf32> to vector<8x1xf32>
    %cst_7 = arith.constant 3.200000e+01 : f32
    %14 = vector.broadcast %cst_7 : f32 to vector<8x1xf32>
    %15 = arith.divf %13, %14 : vector<8x1xf32>
    %16 = vector.broadcast %8 : vector<8x1xf32> to vector<8x32xf32>
    %17 = arith.subf %0, %16 : vector<8x32xf32>
    %cst_8 = arith.constant 9.99999974E-6 : f32
    %18 = vector.broadcast %cst_8 : f32 to vector<8x1xf32>
    %19 = arith.addf %15, %18 : vector<8x1xf32>
    %20 = math.rsqrt %19 : vector<8x1xf32>
    %21 = vector.broadcast %20 : vector<8x1xf32> to vector<8x32xf32>
    %22 = arith.mulf %17, %21 : vector<8x32xf32>
    %23 = vector.shape_cast %2 : vector<32xf32> to vector<1x32xf32>
    %24 = vector.broadcast %23 : vector<1x32xf32> to vector<8x32xf32>
    %25 = arith.mulf %22, %24 : vector<8x32xf32>
    %26 = vector.shape_cast %4 : vector<32xf32> to vector<1x32xf32>
    %27 = vector.broadcast %26 : vector<1x32xf32> to vector<8x32xf32>
    %28 = arith.addf %25, %27 : vector<8x32xf32>
    %c0_9 = arith.constant 0 : index
    %c0_10 = arith.constant 0 : index
    %29 = vector.load %arg4[%c0_9, %c0_10] : memref<32x96xf32, #tpu.memory_space<vmem>>, vector<32x96xf32>
    %cst_11 = arith.constant dense<0.000000e+00> : vector<8x96xf32>
    %30 = tpu.matmul %28, %29, %cst_11 {dimension_numbers = #tpu.dot_dimension_numbers<[1], [0], [0], [1], [0, 0, 1, 1], [], []>} : vector<8x32xf32>, vector<32x96xf32>, vector<8x96xf32> -> vector<8x96xf32>
    %c0_12 = arith.constant 0 : index
    %c0_13 = arith.constant 0 : index
    %31 = vector.load %arg5[%c0_12, %c0_13] : memref<1x96xf32, #tpu.memory_space<vmem>>, vector<1x96xf32>
    %32 = vector.shape_cast %31 : vector<1x96xf32> to vector<96xf32>
    %33 = vector.shape_cast %32 : vector<96xf32> to vector<1x96xf32>
    %34 = vector.broadcast %33 : vector<1x96xf32> to vector<8x96xf32>
    %35 = arith.addf %30, %34 : vector<8x96xf32>
    %36 = tpu.iota {dimensions = array<i32: 0>} : vector<8x8xi32>
    %37 = tpu.iota {dimensions = array<i32: 1>} : vector<8x8xi32>
    %38 = arith.cmpi sle, %37, %36 : vector<8x8xi32>
    %39 = vector.extract_strided_slice %35 {offsets = [0, 0], sizes = [8, 8], strides = [1, 1]} : vector<8x96xf32> to vector<8x8xf32>
    %40 = vector.extract_strided_slice %35 {offsets = [0, 32], sizes = [8, 8], strides = [1, 1]} : vector<8x96xf32> to vector<8x8xf32>
    %41 = vector.extract_strided_slice %35 {offsets = [0, 64], sizes = [8, 8], strides = [1, 1]} : vector<8x96xf32> to vector<8x8xf32>
    "tpu.trace_start"() <{level = 10 : i32, message = "td,sd->ts"}> : () -> ()
    %cst_14 = arith.constant dense<0.000000e+00> : vector<8x8xf32>
    %42 = tpu.matmul %39, %40, %cst_14 {dimension_numbers = #tpu.dot_dimension_numbers<[1], [1], [0], [0], [0, 0, 1, 0], [], []>} : vector<8x8xf32>, vector<8x8xf32>, vector<8x8xf32> -> vector<8x8xf32>
    %cst_15 = arith.constant -1.000000e+30 : f32
    "tpu.trace_stop"() : () -> ()
    %43 = vector.broadcast %cst_15 : f32 to vector<8x8xf32>
    %44 = arith.select %38, %42, %43 : vector<8x8xi1>, vector<8x8xf32>
    %cst_16 = arith.constant dense<0xFF800000> : vector<8xf32>
    %45 = vector.multi_reduction <maximumf>, %44, %cst_16 [1] : vector<8x8xf32> to vector<8xf32>
    %46 = vector.shape_cast %45 : vector<8xf32> to vector<8x1xf32>
    %47 = vector.broadcast %46 : vector<8x1xf32> to vector<8x8xf32>
    %48 = arith.subf %44, %47 : vector<8x8xf32>
    %49 = math.exp %48 : vector<8x8xf32>
    %cst_17 = arith.constant dense<0.000000e+00> : vector<8xf32>
    %50 = vector.multi_reduction <add>, %49, %cst_17 [1] : vector<8x8xf32> to vector<8xf32>
    %51 = vector.shape_cast %50 : vector<8xf32> to vector<8x1xf32>
    %52 = tpu.reciprocal %51 {approx = true} : vector<8x1xf32> -> vector<8x1xf32>
    %53 = vector.broadcast %52 : vector<8x1xf32> to vector<8x8xf32>
    %54 = arith.mulf %49, %53 : vector<8x8xf32>
    %cst_18 = arith.constant dense<0.000000e+00> : vector<8x8xf32>
    %55 = tpu.matmul %54, %41, %cst_18 {dimension_numbers = #tpu.dot_dimension_numbers<[1], [0], [0], [1], [0, 0, 1, 1], [], []>} : vector<8x8xf32>, vector<8x8xf32>, vector<8x8xf32> -> vector<8x8xf32>
    %56 = vector.extract_strided_slice %35 {offsets = [0, 8], sizes = [8, 8], strides = [1, 1]} : vector<8x96xf32> to vector<8x8xf32>
    %57 = vector.extract_strided_slice %35 {offsets = [0, 40], sizes = [8, 8], strides = [1, 1]} : vector<8x96xf32> to vector<8x8xf32>
    %58 = vector.extract_strided_slice %35 {offsets = [0, 72], sizes = [8, 8], strides = [1, 1]} : vector<8x96xf32> to vector<8x8xf32>
    "tpu.trace_start"() <{level = 10 : i32, message = "td,sd->ts"}> : () -> ()
    %cst_19 = arith.constant dense<0.000000e+00> : vector<8x8xf32>
    %59 = tpu.matmul %56, %57, %cst_19 {dimension_numbers = #tpu.dot_dimension_numbers<[1], [1], [0], [0], [0, 0, 1, 0], [], []>} : vector<8x8xf32>, vector<8x8xf32>, vector<8x8xf32> -> vector<8x8xf32>
    %cst_20 = arith.constant -1.000000e+30 : f32
    "tpu.trace_stop"() : () -> ()
    %60 = vector.broadcast %cst_20 : f32 to vector<8x8xf32>
    %61 = arith.select %38, %59, %60 : vector<8x8xi1>, vector<8x8xf32>
    %cst_21 = arith.constant dense<0xFF800000> : vector<8xf32>
    %62 = vector.multi_reduction <maximumf>, %61, %cst_21 [1] : vector<8x8xf32> to vector<8xf32>
    %63 = vector.shape_cast %62 : vector<8xf32> to vector<8x1xf32>
    %64 = vector.broadcast %63 : vector<8x1xf32> to vector<8x8xf32>
    %65 = arith.subf %61, %64 : vector<8x8xf32>
    %66 = math.exp %65 : vector<8x8xf32>
    %cst_22 = arith.constant dense<0.000000e+00> : vector<8xf32>
    %67 = vector.multi_reduction <add>, %66, %cst_22 [1] : vector<8x8xf32> to vector<8xf32>
    %68 = vector.shape_cast %67 : vector<8xf32> to vector<8x1xf32>
    %69 = tpu.reciprocal %68 {approx = true} : vector<8x1xf32> -> vector<8x1xf32>
    %70 = vector.broadcast %69 : vector<8x1xf32> to vector<8x8xf32>
    %71 = arith.mulf %66, %70 : vector<8x8xf32>
    %cst_23 = arith.constant dense<0.000000e+00> : vector<8x8xf32>
    %72 = tpu.matmul %71, %58, %cst_23 {dimension_numbers = #tpu.dot_dimension_numbers<[1], [0], [0], [1], [0, 0, 1, 1], [], []>} : vector<8x8xf32>, vector<8x8xf32>, vector<8x8xf32> -> vector<8x8xf32>
    %73 = vector.extract_strided_slice %35 {offsets = [0, 16], sizes = [8, 8], strides = [1, 1]} : vector<8x96xf32> to vector<8x8xf32>
    %74 = vector.extract_strided_slice %35 {offsets = [0, 48], sizes = [8, 8], strides = [1, 1]} : vector<8x96xf32> to vector<8x8xf32>
    %75 = vector.extract_strided_slice %35 {offsets = [0, 80], sizes = [8, 8], strides = [1, 1]} : vector<8x96xf32> to vector<8x8xf32>
    "tpu.trace_start"() <{level = 10 : i32, message = "td,sd->ts"}> : () -> ()
    %cst_24 = arith.constant dense<0.000000e+00> : vector<8x8xf32>
    %76 = tpu.matmul %73, %74, %cst_24 {dimension_numbers = #tpu.dot_dimension_numbers<[1], [1], [0], [0], [0, 0, 1, 0], [], []>} : vector<8x8xf32>, vector<8x8xf32>, vector<8x8xf32> -> vector<8x8xf32>
    %cst_25 = arith.constant -1.000000e+30 : f32
    "tpu.trace_stop"() : () -> ()
    %77 = vector.broadcast %cst_25 : f32 to vector<8x8xf32>
    %78 = arith.select %38, %76, %77 : vector<8x8xi1>, vector<8x8xf32>
    %cst_26 = arith.constant dense<0xFF800000> : vector<8xf32>
    %79 = vector.multi_reduction <maximumf>, %78, %cst_26 [1] : vector<8x8xf32> to vector<8xf32>
    %80 = vector.shape_cast %79 : vector<8xf32> to vector<8x1xf32>
    %81 = vector.broadcast %80 : vector<8x1xf32> to vector<8x8xf32>
    %82 = arith.subf %78, %81 : vector<8x8xf32>
    %83 = math.exp %82 : vector<8x8xf32>
    %cst_27 = arith.constant dense<0.000000e+00> : vector<8xf32>
    %84 = vector.multi_reduction <add>, %83, %cst_27 [1] : vector<8x8xf32> to vector<8xf32>
    %85 = vector.shape_cast %84 : vector<8xf32> to vector<8x1xf32>
    %86 = tpu.reciprocal %85 {approx = true} : vector<8x1xf32> -> vector<8x1xf32>
    %87 = vector.broadcast %86 : vector<8x1xf32> to vector<8x8xf32>
    %88 = arith.mulf %83, %87 : vector<8x8xf32>
    %cst_28 = arith.constant dense<0.000000e+00> : vector<8x8xf32>
    %89 = tpu.matmul %88, %75, %cst_28 {dimension_numbers = #tpu.dot_dimension_numbers<[1], [0], [0], [1], [0, 0, 1, 1], [], []>} : vector<8x8xf32>, vector<8x8xf32>, vector<8x8xf32> -> vector<8x8xf32>
    %90 = vector.extract_strided_slice %35 {offsets = [0, 24], sizes = [8, 8], strides = [1, 1]} : vector<8x96xf32> to vector<8x8xf32>
    %91 = vector.extract_strided_slice %35 {offsets = [0, 56], sizes = [8, 8], strides = [1, 1]} : vector<8x96xf32> to vector<8x8xf32>
    %92 = vector.extract_strided_slice %35 {offsets = [0, 88], sizes = [8, 8], strides = [1, 1]} : vector<8x96xf32> to vector<8x8xf32>
    "tpu.trace_start"() <{level = 10 : i32, message = "td,sd->ts"}> : () -> ()
    %cst_29 = arith.constant dense<0.000000e+00> : vector<8x8xf32>
    %93 = tpu.matmul %90, %91, %cst_29 {dimension_numbers = #tpu.dot_dimension_numbers<[1], [1], [0], [0], [0, 0, 1, 0], [], []>} : vector<8x8xf32>, vector<8x8xf32>, vector<8x8xf32> -> vector<8x8xf32>
    %cst_30 = arith.constant -1.000000e+30 : f32
    "tpu.trace_stop"() : () -> ()
    %94 = vector.broadcast %cst_30 : f32 to vector<8x8xf32>
    %95 = arith.select %38, %93, %94 : vector<8x8xi1>, vector<8x8xf32>
    %cst_31 = arith.constant dense<0xFF800000> : vector<8xf32>
    %96 = vector.multi_reduction <maximumf>, %95, %cst_31 [1] : vector<8x8xf32> to vector<8xf32>
    %97 = vector.shape_cast %96 : vector<8xf32> to vector<8x1xf32>
    %98 = vector.broadcast %97 : vector<8x1xf32> to vector<8x8xf32>
    %99 = arith.subf %95, %98 : vector<8x8xf32>
    %100 = math.exp %99 : vector<8x8xf32>
    %cst_32 = arith.constant dense<0.000000e+00> : vector<8xf32>
    %101 = vector.multi_reduction <add>, %100, %cst_32 [1] : vector<8x8xf32> to vector<8xf32>
    %102 = vector.shape_cast %101 : vector<8xf32> to vector<8x1xf32>
    %103 = tpu.reciprocal %102 {approx = true} : vector<8x1xf32> -> vector<8x1xf32>
    %104 = vector.broadcast %103 : vector<8x1xf32> to vector<8x8xf32>
    %105 = arith.mulf %100, %104 : vector<8x8xf32>
    %cst_33 = arith.constant dense<0.000000e+00> : vector<8x8xf32>
    %106 = tpu.matmul %105, %92, %cst_33 {dimension_numbers = #tpu.dot_dimension_numbers<[1], [0], [0], [1], [0, 0, 1, 1], [], []>} : vector<8x8xf32>, vector<8x8xf32>, vector<8x8xf32> -> vector<8x8xf32>
    %107 = tpu.concatenate %55, %72, %89, %106 in 1 : vector<8x8xf32>, vector<8x8xf32>, vector<8x8xf32>, vector<8x8xf32> -> vector<8x32xf32>
    %c0_34 = arith.constant 0 : index
    %c0_35 = arith.constant 0 : index
    %108 = vector.load %arg6[%c0_34, %c0_35] : memref<32x32xf32, #tpu.memory_space<vmem>>, vector<32x32xf32>
    %cst_36 = arith.constant dense<0.000000e+00> : vector<8x32xf32>
    %109 = tpu.matmul %107, %108, %cst_36 {dimension_numbers = #tpu.dot_dimension_numbers<[1], [0], [0], [1], [0, 0, 1, 1], [], []>} : vector<8x32xf32>, vector<32x32xf32>, vector<8x32xf32> -> vector<8x32xf32>
    %c0_37 = arith.constant 0 : index
    %c0_38 = arith.constant 0 : index
    %110 = vector.load %arg7[%c0_37, %c0_38] : memref<1x32xf32, #tpu.memory_space<vmem>>, vector<1x32xf32>
    %111 = vector.shape_cast %110 : vector<1x32xf32> to vector<32xf32>
    %112 = vector.shape_cast %111 : vector<32xf32> to vector<1x32xf32>
    %113 = vector.broadcast %112 : vector<1x32xf32> to vector<8x32xf32>
    %114 = arith.addf %109, %113 : vector<8x32xf32>
    %115 = arith.addf %0, %114 : vector<8x32xf32>
    %c0_39 = arith.constant 0 : index
    %c0_40 = arith.constant 0 : index
    %116 = vector.load %arg8[%c0_39, %c0_40] : memref<1x32xf32, #tpu.memory_space<vmem>>, vector<1x32xf32>
    %117 = vector.shape_cast %116 : vector<1x32xf32> to vector<32xf32>
    %c0_41 = arith.constant 0 : index
    %c0_42 = arith.constant 0 : index
    %118 = vector.load %arg9[%c0_41, %c0_42] : memref<1x32xf32, #tpu.memory_space<vmem>>, vector<1x32xf32>
    %119 = vector.shape_cast %118 : vector<1x32xf32> to vector<32xf32>
    %cst_43 = arith.constant dense<0.000000e+00> : vector<8xf32>
    %120 = vector.multi_reduction <add>, %115, %cst_43 [1] : vector<8x32xf32> to vector<8xf32>
    %121 = vector.shape_cast %120 : vector<8xf32> to vector<8x1xf32>
    %cst_44 = arith.constant 3.200000e+01 : f32
    %122 = vector.broadcast %cst_44 : f32 to vector<8x1xf32>
    %123 = arith.divf %121, %122 : vector<8x1xf32>
    %124 = vector.broadcast %123 : vector<8x1xf32> to vector<8x32xf32>
    %125 = arith.subf %115, %124 : vector<8x32xf32>
    %126 = arith.mulf %125, %125 : vector<8x32xf32>
    %cst_45 = arith.constant dense<0.000000e+00> : vector<8xf32>
    %127 = vector.multi_reduction <add>, %126, %cst_45 [1] : vector<8x32xf32> to vector<8xf32>
    %128 = vector.shape_cast %127 : vector<8xf32> to vector<8x1xf32>
    %cst_46 = arith.constant 3.200000e+01 : f32
    %129 = vector.broadcast %cst_46 : f32 to vector<8x1xf32>
    %130 = arith.divf %128, %129 : vector<8x1xf32>
    %131 = vector.broadcast %123 : vector<8x1xf32> to vector<8x32xf32>
    %132 = arith.subf %115, %131 : vector<8x32xf32>
    %cst_47 = arith.constant 9.99999974E-6 : f32
    %133 = vector.broadcast %cst_47 : f32 to vector<8x1xf32>
    %134 = arith.addf %130, %133 : vector<8x1xf32>
    %135 = math.rsqrt %134 : vector<8x1xf32>
    %136 = vector.broadcast %135 : vector<8x1xf32> to vector<8x32xf32>
    %137 = arith.mulf %132, %136 : vector<8x32xf32>
    %138 = vector.shape_cast %117 : vector<32xf32> to vector<1x32xf32>
    %139 = vector.broadcast %138 : vector<1x32xf32> to vector<8x32xf32>
    %140 = arith.mulf %137, %139 : vector<8x32xf32>
    %141 = vector.shape_cast %119 : vector<32xf32> to vector<1x32xf32>
    %142 = vector.broadcast %141 : vector<1x32xf32> to vector<8x32xf32>
    %143 = arith.addf %140, %142 : vector<8x32xf32>
    %c0_48 = arith.constant 0 : index
    %c0_49 = arith.constant 0 : index
    %144 = vector.load %arg10[%c0_48, %c0_49] : memref<32x128xf32, #tpu.memory_space<vmem>>, vector<32x128xf32>
    %cst_50 = arith.constant dense<0.000000e+00> : vector<8x128xf32>
    %145 = tpu.matmul %143, %144, %cst_50 {dimension_numbers = #tpu.dot_dimension_numbers<[1], [0], [0], [1], [0, 0, 1, 1], [], []>} : vector<8x32xf32>, vector<32x128xf32>, vector<8x128xf32> -> vector<8x128xf32>
    %c0_51 = arith.constant 0 : index
    %c0_52 = arith.constant 0 : index
    %146 = vector.load %arg11[%c0_51, %c0_52] : memref<1x128xf32, #tpu.memory_space<vmem>>, vector<1x128xf32>
    %147 = vector.shape_cast %146 : vector<1x128xf32> to vector<128xf32>
    %148 = vector.shape_cast %147 : vector<128xf32> to vector<1x128xf32>
    %149 = vector.broadcast %148 : vector<1x128xf32> to vector<8x128xf32>
    %150 = arith.addf %145, %149 : vector<8x128xf32>
    %cst_53 = arith.constant 5.000000e-01 : f32
    %151 = vector.broadcast %cst_53 : f32 to vector<8x128xf32>
    %152 = arith.mulf %151, %150 : vector<8x128xf32>
    %cst_54 = arith.constant 0.707106769 : f32
    %153 = vector.broadcast %cst_54 : f32 to vector<8x128xf32>
    %154 = arith.mulf %150, %153 : vector<8x128xf32>
    %155 = math.erf %154 : vector<8x128xf32>
    %cst_55 = arith.constant 1.000000e+00 : f32
    %156 = vector.broadcast %cst_55 : f32 to vector<8x128xf32>
    %157 = arith.addf %156, %155 : vector<8x128xf32>
    %158 = arith.mulf %152, %157 : vector<8x128xf32>
    %c0_56 = arith.constant 0 : index
    %c0_57 = arith.constant 0 : index
    %159 = vector.load %arg12[%c0_56, %c0_57] : memref<128x32xf32, #tpu.memory_space<vmem>>, vector<128x32xf32>
    %cst_58 = arith.constant dense<0.000000e+00> : vector<8x32xf32>
    %160 = tpu.matmul %158, %159, %cst_58 {dimension_numbers = #tpu.dot_dimension_numbers<[1], [0], [0], [1], [0, 0, 1, 1], [], []>} : vector<8x128xf32>, vector<128x32xf32>, vector<8x32xf32> -> vector<8x32xf32>
    %c0_59 = arith.constant 0 : index
    %c0_60 = arith.constant 0 : index
    %161 = vector.load %arg13[%c0_59, %c0_60] : memref<1x32xf32, #tpu.memory_space<vmem>>, vector<1x32xf32>
    %162 = vector.shape_cast %161 : vector<1x32xf32> to vector<32xf32>
    %163 = vector.shape_cast %162 : vector<32xf32> to vector<1x32xf32>
    %164 = vector.broadcast %163 : vector<1x32xf32> to vector<8x32xf32>
    %165 = arith.addf %160, %164 : vector<8x32xf32>
    %166 = arith.addf %115, %165 : vector<8x32xf32>
    %c0_61 = arith.constant 0 : index
    %c0_62 = arith.constant 0 : index
    %167 = vector.load %arg14[%c0_61, %c0_62] : memref<8x32xf32, #tpu.memory_space<vmem>>, vector<8x32xf32>
    tpu.vector_store %arg14[%c0_61, %c0_62], %166 {strides = array<i32>} : memref<8x32xf32, #tpu.memory_space<vmem>>, vector<8x32xf32>,
    return
  }
  func.func @transform_0(%arg0: i32) -> (i32, i32) {
    %c0_i32 = arith.constant 0 : i32
    %c0_i32_0 = arith.constant 0 : i32
    return %arg0, %c0_i32 : i32, i32
  }
  func.func @transform_1(%arg0: i32) -> (i32, i32) {
    %c0_i32 = arith.constant 0 : i32
    %c0_i32_0 = arith.constant 0 : i32
    %c0_i32_1 = arith.constant 0 : i32
    return %c0_i32, %c0_i32_0 : i32, i32
  }
  func.func @transform_2(%arg0: i32) -> (i32, i32) {
    %c0_i32 = arith.constant 0 : i32
    %c0_i32_0 = arith.constant 0 : i32
    %c0_i32_1 = arith.constant 0 : i32
    return %c0_i32, %c0_i32_0 : i32, i32
  }
  func.func @transform_3(%arg0: i32) -> (i32, i32) {
    %c0_i32 = arith.constant 0 : i32
    %c0_i32_0 = arith.constant 0 : i32
    %c0_i32_1 = arith.constant 0 : i32
    return %c0_i32, %c0_i32_0 : i32, i32
  }
  func.func @transform_4(%arg0: i32) -> (i32, i32) {
    %c0_i32 = arith.constant 0 : i32
    %c0_i32_0 = arith.constant 0 : i32
    %c0_i32_1 = arith.constant 0 : i32
    return %c0_i32, %c0_i32_0 : i32, i32
  }
  func.func @transform_5(%arg0: i32) -> (i32, i32) {
    %c0_i32 = arith.constant 0 : i32
    %c0_i32_0 = arith.constant 0 : i32
    %c0_i32_1 = arith.constant 0 : i32
    return %c0_i32, %c0_i32_0 : i32, i32
  }
  func.func @transform_6(%arg0: i32) -> (i32, i32) {
    %c0_i32 = arith.constant 0 : i32
    %c0_i32_0 = arith.constant 0 : i32
    %c0_i32_1 = arith.constant 0 : i32
    return %c0_i32, %c0_i32_0 : i32, i32
  }
  func.func @transform_7(%arg0: i32) -> (i32, i32) {
    %c0_i32 = arith.constant 0 : i32
    %c0_i32_0 = arith.constant 0 : i32
    %c0_i32_1 = arith.constant 0 : i32
    return %c0_i32, %c0_i32_0 : i32, i32
  }
  func.func @transform_8(%arg0: i32) -> (i32, i32) {
    %c0_i32 = arith.constant 0 : i32
    %c0_i32_0 = arith.constant 0 : i32
    %c0_i32_1 = arith.constant 0 : i32
    return %c0_i32, %c0_i32_0 : i32, i32
  }
  func.func @transform_9(%arg0: i32) -> (i32, i32) {
    %c0_i32 = arith.constant 0 : i32
    %c0_i32_0 = arith.constant 0 : i32
    %c0_i32_1 = arith.constant 0 : i32
    return %c0_i32, %c0_i32_0 : i32, i32
  }
  func.func @transform_10(%arg0: i32) -> (i32, i32) {
    %c0_i32 = arith.constant 0 : i32
    %c0_i32_0 = arith.constant 0 : i32
    %c0_i32_1 = arith.constant 0 : i32
    return %c0_i32, %c0_i32_0 : i32, i32
  }
  func.func @transform_11(%arg0: i32) -> (i32, i32) {
    %c0_i32 = arith.constant 0 : i32
    %c0_i32_0 = arith.constant 0 : i32
    %c0_i32_1 = arith.constant 0 : i32
    return %c0_i32, %c0_i32_0 : i32, i32
  }
  func.func @transform_12(%arg0: i32) -> (i32, i32) {
    %c0_i32 = arith.constant 0 : i32
    %c0_i32_0 = arith.constant 0 : i32
    %c0_i32_1 = arith.constant 0 : i32
    return %c0_i32, %c0_i32_0 : i32, i32
  }
  func.func @transform_13(%arg0: i32) -> (i32, i32) {
    %c0_i32 = arith.constant 0 : i32
    %c0_i32_0 = arith.constant 0 : i32
    return %arg0, %c0_i32 : i32, i32
  }
}

</mosaic_0001>

<bundles_post_ra>
// kernel: gpt_block.1
= control target key start
LH: loop header
LB: loop body
LE: loop exit
PB: predicated region body
PF: predicated region fallthrough
CT: control target
= control target key end

     0   :  { %s2381_s0 = inlined_call_operand.vmem [shape: f32[16,32], index: 0, kind: input, shape index: {}]   ;;  %s2382_s1 = inlined_call_operand.vmem [shape: f32[1,32], index: 1, kind: input, shape index: {}]   ;;  %s2383_s2 = inlined_call_operand.vmem [shape: f32[1,32], index: 2, kind: input, shape index: {}]   ;;  %s2384_s3 = inlined_call_operand.vmem [shape: f32[32,96], index: 3, kind: input, shape index: {}]   ;;  %s2385_s4 = inlined_call_operand.vmem [shape: f32[1,96], index: 4, kind: input, shape index: {}]   ;;  %s2386_s5 = inlined_call_operand.vmem [shape: f32[32,32], index: 5, kind: input, shape index: {}]   ;;  %s2387_s6 = inlined_call_operand.vmem [shape: f32[1,32], index: 6, kind: input, shape index: {}]   ;;  %s2388_s7 = inlined_call_operand.vmem [shape: f32[1,32], index: 7, kind: input, shape index: {}]   ;;  %s2389_s8 = inlined_call_operand.vmem [shape: f32[1,32], index: 8, kind: input, shape index: {}]   ;;  %s2390_s9 = inlined_call_operand.vmem [shape: f32[32,128], index: 9, kind: input, shape index: {}]   ;;  %s2391_s10 = inlined_call_operand.vmem [shape: f32[1,128], index: 10, kind: input, shape index: {}]   ;;  %s2392_s11 = inlined_call_operand.vmem [shape: f32[128,32], index: 11, kind: input, shape index: {}]   ;;  %s2393_s12 = inlined_call_operand.vmem [shape: f32[1,32], index: 12, kind: input, shape index: {}]   ;;  %s2394_s13 = inlined_call_operand.hbm [shape: f32[16,32], index: 13, kind: output, shape index: {}]  }
   0x1   :  { %2395 = sst [smem:[#allocation5_spill]] %s2381_s0 }
   0x2   :  { %2396 = sst [smem:[#allocation6_spill]] %s2382_s1 }
   0x3   :  { %2397 = sst [smem:[#allocation7_spill]] %s2383_s2 }
   0x4   :  { %18 = vsyncpa [#allocation3], 0 }
   0x5   :  { %20 = vsyncpa [#allocation3 + $0x1], 0  ;;  %s2070_s25 = smov 0   ;;  %s2072_s26 = smov 0  }
   0x6   :  { %s2074_s27 = smov 0   ;;  %s2076_s28 = smov 0  }
   0x7 LB: > { %s2091_s29 = sadd.s32 4294967295, %s1980_s28   ;;  %s1609_s30 = sadd.s32 4294967294, %s1980_s28   ;;  %s1980_s28 = sphi %s2076_s28, %s2406_s28   ;;  %s1976_s27 = sphi %s2074_s27, %s2405_s27   ;;  %s1972_s26 = sphi %s2072_s26, %s2404_s26   ;;  %s1968_s25 = sphi %s2070_s25, %s2403_s25  }
   0x8   : > { %s2095_s14 = sadd.s32 1, %s1980_s28   ;;  %s311_s15 = sadd.s32 1, %s1976_s27 }
   0x9   : > { %s308_s16 = ssub.s32 %s1980_s28, %s2095_s14  ;;  %p321_p0 = scmp.ne.s32.totalorder %s1976_s27, %s1972_s26 }
   0xa   : > { %p309_p1 = scmp.eq.s32.totalorder %s308_s16, 0  ;;  %p322_p2 = scmp.eq.s32.totalorder %s2091_s29, 1 }
   0xb   : > { %p327_p3 = scmp.ne.s32.totalorder %s1972_s26, %s1968_s25  ;;  %p328_p4 = scmp.eq.s32.totalorder %s1609_s30, 1 }
   0xc   : > { %s2106_s17 = scalar_select %p309_p1, %s1976_s27, %s311_s15  }
   0xd   : > { %p2108_p5 = por %p322_p2, %p321_p0  ;;  %p2112_p6 = por %p328_p4, %p327_p3 }
   0xe   : > { %p1612_p7 = scmp.ge.s32.totalorder %s1980_s28, 1  ;;  %p389_p8 = scmp.lt.s32.totalorder %s1980_s28, 3 }
  0x10   : > { %p390_p9 = pnand %p1612_p7, %p389_p8 }
  0x11   : > { %p432_p10 = scmp.lt.s32.totalorder (!%p390_p9), %s2091_s29, 1  ;;  %vm439_vm0 = vcmask (!%p390_p9), 261120   ;;  %s2400_s0 = sld [smem:[#allocation5_spill]] (!%p390_p9)  ;;  %v468_v7 = vld [vmem:[%s2384_s3] sm:$0xff] (!%p390_p9)  ;;  %v469_v8 = vld [vmem:[%s2384_s3 + $0x8] sm:$0xff] (!%p390_p9)  ;;  %v470_v9 = vld [vmem:[%s2384_s3 + $0x10] sm:$0xff] (!%p390_p9)  ;;  %v552_v35 = vlaneseq (!%p390_p9) }
  0x12   : > { %393 = sbr.rel (%p390_p9) target bundleno = 2537 (0x9e9), region = 72  ;;  %v1982_v10 = vmov (!%p390_p9), 0.0|0.0   ;;  %v1799_v11 = vpack.c.bf16 (!%p390_p9), %v469_v8, %v468_v7  ;;  %v471_v12 = vld [vmem:[%s2384_s3 + $0x18] sm:$0xff] (!%p390_p9)  ;;  %vm1983_vm1 = vmmov (!%p390_p9), 0   ;;  %v1984_v13 = vmov (!%p390_p9), 0.0   ;;  %s2401_s1 = sld [smem:[#allocation6_spill]] (!%p390_p9) }
  0x13   : > { %1798 = vmatprep.subr.bf16.mxu1 (!%p390_p9), %v1982_v10  ;;  %1698 = vmatprep.mubr.msk.f32.mxu1 (!%p390_p9), %vm1983_vm1, %v1984_v13  ;;  %v1802_v14 = vpack.c.bf16 (!%p390_p9), %v471_v12, %v470_v9  ;;  %s2402_s2 = sld [smem:[#allocation7_spill]] (!%p390_p9)  ;;  %v1617_v24 = vld [vmem:[%s2385_s4] ss:$0 sm:$0xff] (!%p390_p9)  ;;  %s1985_s23 = smov (!%p390_p9), 120   ;;  %vm560_vm2 = vcmask (!%p390_p9), 64512   ;;  %v553_v36 = vshrl.u32 (!%p390_p9), %v552_v35, 7 }
  0x14   : > { %1711 = vmatprep.subr.mxu0 (!%p390_p9), %v1984_v13  ;;  %1713 = vmatprep.mubr.msk.f32.mxu0 (!%p390_p9), %vm1983_vm1, %v1984_v13  ;;  %s1987_s30 = smov (!%p390_p9), 88   ;;  %s1988_s15 = smov (!%p390_p9), 80   ;;  %v555_v37 = vand.u32 (!%p390_p9), 127, %v552_v35  ;;  %v1241_v35 = vld [vmem:[%s2386_s5 + $0x18] sm:$0xff] (!%p390_p9)  ;;  %vm1234_vm4 = vcmask (!%p390_p9), 130048   ;;  %vm1236_vm5 = vcmask (!%p390_p9), 195584  }
  0x15   : > { %1800 = vmatpush3.bf16.msra.mxu1 (!%p390_p9), %v1799_v11  ;;  %s1989_s16 = smov (!%p390_p9), 112   ;;  %s1992_s22 = smov (!%p390_p9), 64  }
  0x16   : > { %1801 = vmatprep.subr.bf16.mxu1 (!%p390_p9), %v1982_v10  ;;  %vm556_vm3 = vcmp.le.s32.totalorder (!%p390_p9), %v555_v37, %v553_v36 }
  0x18   : > { %v1615_v19 = vld [vmem:[%s2401_s1] ss:$0 sm:$0xff] (!%p390_p9) }
  0x19   : > { %s433_s20 = scalar_select %p432_p10, %s2091_s29, 1  ;;  %1803 = vmatpush3.bf16.msra.mxu1 %v1802_v14  ;;  %v1616_v21 = vld [vmem:[%s2402_s2] ss:$0 sm:$0xff] }
  0x1a   : > { %1701 = vmatprep.subr.mxu1 %v1984_v13 }
  0x1b   : > { %s1614_s21 = sshll.u32 %s433_s20, 3  ;;  %s1990_s20 = smov 72  }
  0x1c   : > { %s435_s24 = scalar_lea.vmem %s2400_s0, %s1614_s21  ;;  %s1991_s21 = smov 104  }
  0x1d   : > { %v2123_v0 = vld [vmem:[%s435_s24] sm:$0xff]  ;;  %s1986_s24 = smov 96   ;;  %s1639_s0 = sshll.u32 %s2091_s29, 7 }
  0x1e   : > { %v440_v1 = vsel %vm439_vm0, %v2123_v0, 0.0 }
  0x1f   : > { %441 = vadd.xlane.f32.xlu0 %v440_v1 }
  0xac   : > { %v442_v2 = vpop.xlane.xlu0 %441 }
  0xad   : > { %v444_v3 = vmul.f32 0.03125, %v442_v2 }
  0xaf   : > { %v445_v4 = vsub.f32 %v2123_v0, %v444_v3 }
  0xb1   : > { %v446_v5 = vmul.f32 %v445_v4, %v445_v4 }
  0xb3   : > { %v447_v6 = vsel %vm439_vm0, %v446_v5, 0.0 }
  0xb4   : > { %448 = vadd.xlane.f32.xlu0 %v447_v6 }
 0x141   : > { %v449_v15 = vpop.xlane.xlu0 %448 }
 0x142   : > { %v450_v16 = vmul.f32 0.03125, %v449_v15 }
 0x144   : > { %v451_v17 = vadd.f32 1e-05, %v450_v16 }
 0x146   : > { %1896 = vrsqrt.f32 %v451_v17 }
 0x150   : > { %v1897_v18 = vpop.eup %1896 }
 0x151   : > { %v453_v20 = vmul.f32 %v1897_v18, %v445_v4 }
 0x153   : > { %v460_v22 = vmul.f32 %v1615_v19, %v453_v20 }
 0x155   : > { %v467_v23 = vadd.f32 %v1616_v21, %v460_v22 }
 0x157   : > { %1699 = vmatmul.mubr.msk.f32.vlgmr.msra.gmra.mrb[0].mxu1 %vm439_vm0, %v467_v23 }
 0x158   : > { %1703 = vmatprep.mubr.msk.f32.mxu1 %vm1983_vm1, %v1984_v13 }
 0x22a   : > { %v548_v25 = vpop.f32.mrb[0].mxu1 }
 0x22b   : > { %v2161_v26 = vadd.f32 %v1617_v24, %v548_v25  ;;  %v1700_v27 = vpop.f32.mrb[1].mxu1 }
 0x22d   : > { %723 = vrot.lane.b32.xlu0 %v2161_v26, %s1985_s23  ;;  %558 = vrot.lane.b32.xlu1 %v2161_v26, %s1986_s24  ;;  %s1993_s23 = smov 48   ;;  %s1994_s24 = smov 40  }
 0x231   : > { %725 = vrot.lane.b32.xlu1 %v2161_v26, %s1987_s30  ;;  %s1995_s30 = smov 56  }
 0x235   : > { %891 = vrot.lane.b32.xlu1 %v2161_v26, %s1988_s15  ;;  %s1996_s15 = smov 8  }
 0x239   : > { %889 = vrot.lane.b32.xlu1 %v2161_v26, %s1989_s16  ;;  %s1997_s16 = smov 16  }
 0x23d   : > { %1057 = vrot.lane.b32.xlu1 %v2161_v26, %s1990_s20  ;;  %s1998_s20 = smov 24  }
 0x241   : > { %1055 = vrot.lane.b32.xlu1 %v2161_v26, %s1991_s21  ;;  %s429_s21 = sand.u32 1, %s1972_s26  }
 0x29f   : > { %v559_v28 = vpop.permute.xlu1 %558  ;;  %v724_v30 = vpop.permute.xlu0 %723 }
 0x2a0   : > { %1702 = vmatpush3.xpose.msk.msra.mxu1 %vm560_vm2, %v559_v28 }
 0x2a1   : > { %1706 = vmatprep.subr.mxu1 %v1984_v13 }
 0x2a3   : > { %1704 = vmatmul.mubr.msk.f32.vlgmr.msra.gmra.mrb[2].mxu1 %vm560_vm2, %v2161_v26  ;;  %v726_v29 = vpop.permute.xlu1 %725 }
 0x2a4   : > { %1712 = vmatpush3.xpose.msk.msra.mxu0 %vm560_vm2, %v726_v29  ;;  %1708 = vmatprep.mubr.msk.f32.mxu1 %vm1983_vm1, %v1984_v13  ;;  %v1238_v29 = vld [vmem:[%s2386_s5] sm:$0xff] }
 0x2a5   : > { %1721 = vmatprep.subr.mxu0 %v1984_v13 }
 0x2a7   : > { %1714 = vmatmul.mubr.msk.f32.vlgmr.msra.gmra.mrb[0].mxu0 %vm560_vm2, %v724_v30  ;;  %v892_v31 = vpop.permute.xlu1 %891  ;;  %v1239_v30 = vld [vmem:[%s2386_s5 + $0x8] sm:$0xff] }
 0x2a8   : > { %1722 = vmatpush3.xpose.msk.msra.mxu0 %vm560_vm2, %v892_v31  ;;  %1723 = vmatprep.mubr.msk.f32.mxu0 %vm1983_vm1, %v1984_v13  ;;  %v1805_v31 = vpack.c.bf16 %v1239_v30, %v1238_v29  ;;  %v1453_v30 = vld [vmem:[%s2392_s11 + $0x60] sm:$0xff] }
 0x2a9   : > { %1731 = vmatprep.subr.mxu0 %v1984_v13 }
 0x2ab   : > { %v890_v32 = vpop.permute.xlu1 %889 }
 0x2ac   : > { %1724 = vmatmul.mubr.msk.f32.vlgmr.msra.gmra.mrb[2].mxu0 %vm560_vm2, %v890_v32 }
 0x2ad   : > { %1733 = vmatprep.mubr.msk.f32.mxu0 %vm1983_vm1, %v1984_v13 }
 0x2af   : > { %v1058_v33 = vpop.permute.xlu1 %1057 }
 0x2b0   : > { %1732 = vmatpush3.xpose.msk.msra.mxu0 %vm560_vm2, %v1058_v33 }
 0x2b1   : > { %1816 = vmatprep.subr.bf16.mxu0 %v1982_v10 }
 0x2b3   : > { %v1056_v34 = vpop.permute.xlu1 %1055 }
 0x2b4   : > { %1734 = vmatmul.mubr.msk.f32.vlgmr.msra.gmra.mrb[4].mxu0 %vm560_vm2, %v1056_v34  ;;  %v1240_v34 = vld [vmem:[%s2386_s5 + $0x10] sm:$0xff] }
 0x2b5   : > { %1795 = vmatprep.mubr.msk.f32.mxu0 %vm1983_vm1, %v1984_v13  ;;  %v1808_v36 = vpack.c.bf16 %v1241_v35, %v1240_v34  ;;  %v1456_v34 = vld [vmem:[%s2392_s11 + $0x78] sm:$0xff] }
 0x376   : > { %v631_v38 = vpop.f32.mrb[2].mxu1 }
 0x377   : > { %v635_v39 = vsel %vm556_vm3, %v631_v38, -1e+30  ;;  %v1705_v40 = vpop.f32.mrb[3].mxu1 }
 0x378   : > { %v636_v41 = vsel %vm560_vm2, %v635_v39, -inf }
 0x379   : > { %637 = vmax.xlane.f32.xlu1 %v636_v41 }
 0x37a   : > { %v797_v42 = vpop.f32.mrb[0].mxu0 }
 0x37b   : > { %v801_v43 = vsel %vm556_vm3, %v797_v42, -1e+30  ;;  %v1715_v44 = vpop.f32.mrb[1].mxu0 }
 0x37c   : > { %v802_v45 = vsel %vm560_vm2, %v801_v43, -inf }
 0x37d   : > { %803 = vmax.xlane.f32.xlu0 %v802_v45 }
 0x37f   : > { %v963_v46 = vpop.f32.mrb[2].mxu0 }
 0x380   : > { %v967_v47 = vsel %vm556_vm3, %v963_v46, -1e+30  ;;  %v1725_v48 = vpop.f32.mrb[3].mxu0 }
 0x381   : > { %v968_v49 = vsel %vm560_vm2, %v967_v47, -inf }
 0x382   : > { %969 = vmax.xlane.f32.xlu1 %v968_v49  ;;  %v1631_v49 = vld [vmem:[%s2387_s6] ss:$0 sm:$0xff] }
 0x387   : > { %v1129_v50 = vpop.f32.mrb[4].mxu0 }
 0x388   : > { %v1133_v51 = vsel %vm556_vm3, %v1129_v50, -1e+30  ;;  %v1735_v52 = vpop.f32.mrb[5].mxu0 }
 0x389   : > { %v1134_v53 = vsel %vm560_vm2, %v1133_v51, -inf }
 0x38a   : > { %1135 = vmax.xlane.f32.xlu0 %v1134_v53 }
 0x393   : > { %647 = vrot.lane.b32.xlu1 %v2161_v26, %s1992_s22  ;;  %s1613_s22 = sshll.u32 %s429_s21, 3 }
 0x394   : > { %s431_s1 = scalar_lea.vmem [#allocation2], %s1613_s22  ;;  %s1999_s22 = smov [#allocation2]  }
 0x406   : > { %v638_v54 = vpop.xlane.xlu1 %637 }
 0x407   : > { %v639_v55 = vsub.f32 %v635_v39, %v638_v54 }
 0x409   : > { %v640_v56 = vmul.f32 1.442695, %v639_v55 }
 0x40a   : > { %v804_v57 = vpop.xlane.xlu0 %803 }
 0x40b   : > { %1898 = vpow2.f32 %v640_v56  ;;  %v805_v58 = vsub.f32 %v801_v43, %v804_v57 }
 0x40d   : > { %v806_v59 = vmul.f32 1.442695, %v805_v58 }
 0x40f   : > { %1900 = vpow2.f32 %v806_v59  ;;  %v970_v60 = vpop.xlane.xlu1 %969  ;;  %v1352_v59 = vld [vmem:[%s2390_s9] sm:$0xff] }
 0x410   : > { %v971_v61 = vsub.f32 %v967_v47, %v970_v60 }
 0x412   : > { %v972_v62 = vmul.f32 1.442695, %v971_v61  ;;  %v1354_v61 = vld [vmem:[%s2390_s9 + $0x10] sm:$0xff] }
 0x413   : > { %v648_v63 = vpop.permute.xlu1 %647 }
 0x414   : > { %1902 = vpow2.f32 %v972_v62  ;;  %1707 = vmatpush3.msra.mxu1 %v648_v63  ;;  %v1355_v62 = vld [vmem:[%s2390_s9 + $0x18] sm:$0xff] }
 0x415   : > { %v1899_v1 = vpop.eup %1898  ;;  %1716 = vmatprep.subr.mxu1 %v1984_v13  ;;  %v1814_v63 = vpack.c.bf16 %v1355_v62, %v1354_v61 }
 0x416   : > { %v642_v2 = vsel %vm560_vm2, %v1899_v1, 0.0 }
 0x417   : > { %v1136_v3 = vpop.xlane.xlu0 %1135  ;;  %643 = vadd.xlane.f32.xlu1 %v642_v2  ;;  %v1442_v2 = vld [vmem:[%s2392_s11 + $0x8] sm:$0xff] }
 0x418   : > { %v1137_v4 = vsub.f32 %v1133_v51, %v1136_v3  ;;  %v1443_v3 = vld [vmem:[%s2392_s11 + $0x10] sm:$0xff] }
 0x419   : > { %v1901_v5 = vpop.eup %1900 }
 0x41a   : > { %v1138_v6 = vmul.f32 1.442695, %v1137_v4  ;;  %v808_v7 = vsel %vm560_vm2, %v1901_v5, 0.0 }
 0x41b   : > { %809 = vadd.xlane.f32.xlu0 %v808_v7  ;;  %v1445_v7 = vld [vmem:[%s2392_s11 + $0x20] sm:$0xff] }
 0x41c   : > { %1904 = vpow2.f32 %v1138_v6 }
 0x41e   : > { %v1903_v8 = vpop.eup %1902 }
 0x41f   : > { %v974_v9 = vsel %vm560_vm2, %v1903_v8, 0.0 }
 0x420   : > { %975 = vadd.xlane.f32.xlu1 %v974_v9 }
 0x426   : > { %v1905_v11 = vpop.eup %1904 }
 0x427   : > { %v1140_v12 = vsel %vm560_vm2, %v1905_v11, 0.0 }
 0x428   : > { %1141 = vadd.xlane.f32.xlu0 %v1140_v12 }
 0x431   : > { %979 = vrot.lane.b32.xlu1 %v2161_v26, %s1993_s23  ;;  %s1537_s23 = scalar_lea.sflag [#allocation3], %s429_s21 }
 0x435   : > { %1145 = vrot.lane.b32.xlu1 %v2161_v26, %s1994_s24  ;;  %s1922_s24 = sshll.u32 %s1999_s22, 4  ;;  %s1923_s24 = int_to_ptr.vmem [resolvable:$false] %s1922_s24 }
 0x436   : > { %s1924_s2 = scalar_lea.vmem %s1923_s24, 256 }
 0x43e   : > { %813 = vrot.lane.b32.xlu0 %v2161_v26, %s1995_s30  ;;  %s1550_s30 = sshll.u32 %s431_s1, 4  ;;  %s2340_s30 = int_to_ptr.vmem [resolvable:$true] %s1550_s30 }
 0x43f   : > { %s1918_s29 = scalar_lea.vmem %s2340_s30, 128  ;;  %p1925_p0 = scmp.lt.s32.totalorder %s2340_s30, %s1923_s24 }
 0x440   : > { %p1919_p11 = scmp.ne.s32.totalorder %s2340_s30, %s1918_s29  ;;  %p1926_p1 = scmp.lt.s32.totalorder %s1924_s2, %s1918_s29 }
 0x442   : > { %p1920_p12 = pnand %p1919_p11, %p2108_p5  ;;  %p1927_p2 = por %p1926_p1, %p1925_p0 }
 0x444   : > { %p1921_p13 = pneg %p1920_p12 }
 0x446   : > { %p1928_p3 = pnand %p1927_p2, %p1921_p13 }
 0x4a4   : > { %v644_v14 = vpop.xlane.xlu1 %643 }
 0x4a5   : > { %1906 = vrcp.f32 %v644_v14 }
 0x4a8   : > { %v810_v15 = vpop.xlane.xlu0 %809 }
 0x4a9   : > { %1908 = vrcp.f32 %v810_v15 }
 0x4ad   : > { %v976_v16 = vpop.xlane.xlu1 %975 }
 0x4ae   : > { %1910 = vrcp.f32 %v976_v16  ;;  %v1633_v16 = vld [vmem:[%s2388_s7] ss:$0 sm:$0xff] }
 0x4af   : > { %v1907_v17 = vpop.eup %1906 }
 0x4b0   : > { %v646_v18 = vmul.f32 %v1907_v17, %v1899_v1  ;;  %v1441_v1 = vld [vmem:[%s2392_s11] sm:$0xff] }
 0x4b1   : > { %v980_v22 = vpop.permute.xlu1 %979  ;;  %v1817_v4 = vpack.c.bf16 %v1442_v2, %v1441_v1 }
 0x4b2   : > { %1709 = vmatmul.mubr.msk.f32.vlgmr.msra.gmra.mrb[4].mxu1 %vm560_vm2, %v646_v18  ;;  %v1634_v18 = vld [vmem:[%s2389_s8] ss:$0 sm:$0xff] }
 0x4b3   : > { %1718 = vmatprep.mubr.msk.f32.mxu1 %vm1983_vm1, %v1984_v13  ;;  %v1909_v20 = vpop.eup %1908  ;;  %1818 = vmatpush3.bf16.msra.mxu0 %v1817_v4 }
 0x4b4   : > { %v812_v21 = vmul.f32 %v1909_v20, %v1901_v5  ;;  %v1444_v5 = vld [vmem:[%s2392_s11 + $0x18] sm:$0xff]  ;;  %1819 = vmatprep.subr.bf16.mxu0 %v1982_v10 }
 0x4b5   : > { %v1142_v19 = vpop.xlane.xlu0 %1141  ;;  %v1146_v26 = vpop.permute.xlu1 %1145  ;;  %v1820_v6 = vpack.c.bf16 %v1444_v5, %v1443_v3 }
 0x4b6   : > { %1912 = vrcp.f32 %v1142_v19 }
 0x4b7   : > { %1821 = vmatpush3.bf16.msra.mxu0 %v1820_v6 }
 0x4b8   : > { %v1911_v24 = vpop.eup %1910  ;;  %1822 = vmatprep.subr.bf16.mxu0 %v1982_v10 }
 0x4b9   : > { %v814_v23 = vpop.permute.xlu0 %813  ;;  %v978_v25 = vmul.f32 %v1911_v24, %v1903_v8  ;;  %v1446_v8 = vld [vmem:[%s2392_s11 + $0x28] sm:$0xff]  ;;  %v1449_v24 = vld [vmem:[%s2392_s11 + $0x40] sm:$0xff] }
 0x4ba   : > { %1717 = vmatpush3.msra.mxu1 %v814_v23  ;;  %v1823_v9 = vpack.c.bf16 %v1446_v8, %v1445_v7 }
 0x4bb   : > { %1719 = vmatmul.mubr.msk.f32.vlgmr.msra.gmra.mrb[6].mxu1 %vm560_vm2, %v812_v21  ;;  %1726 = vmatprep.subr.mxu1 %v1984_v13  ;;  %v1447_v21 = vld [vmem:[%s2392_s11 + $0x30] sm:$0xff] }
 0x4bc   : > { %1727 = vmatpush3.msra.mxu1 %v980_v22  ;;  %1728 = vmatprep.mubr.msk.f32.mxu1 %vm1983_vm1, %v1984_v13  ;;  %v1448_v22 = vld [vmem:[%s2392_s11 + $0x38] sm:$0xff] }
 0x4bd   : > { %1736 = vmatprep.subr.mxu1 %v1984_v13  ;;  %1824 = vmatpush3.bf16.msra.mxu0 %v1823_v9  ;;  %v1826_v23 = vpack.c.bf16 %v1448_v22, %v1447_v21 }
 0x4be   : > { %1825 = vmatprep.subr.bf16.mxu0 %v1982_v10 }
 0x4bf   : > { %1729 = vmatmul.mubr.msk.f32.vlgmr.msra.gmra.mrb[8].mxu1 %vm560_vm2, %v978_v25  ;;  %v1450_v25 = vld [vmem:[%s2392_s11 + $0x48] sm:$0xff] }
 0x4c0   : > { %v1913_v27 = vpop.eup %1912  ;;  %1737 = vmatpush3.msra.mxu1 %v1146_v26  ;;  %1738 = vmatprep.mubr.msk.f32.mxu1 %vm1983_vm1, %v1984_v13  ;;  %v1829_v26 = vpack.c.bf16 %v1450_v25, %v1449_v24 }
 0x4c1   : > { %v1144_v28 = vmul.f32 %v1913_v27, %v1905_v11  ;;  %1804 = vmatprep.subr.bf16.mxu1 %v1982_v10  ;;  %1827 = vmatpush3.bf16.msra.mxu0 %v1826_v23  ;;  %v1451_v27 = vld [vmem:[%s2392_s11 + $0x50] sm:$0xff] }
 0x4c2   : > { %1828 = vmatprep.subr.bf16.mxu0 %v1982_v10 }
 0x4c3   : > { %1739 = vmatmul.mubr.msk.f32.vlgmr.msra.gmra.mrb[10].mxu1 %vm560_vm2, %v1144_v28  ;;  %v1452_v28 = vld [vmem:[%s2392_s11 + $0x58] sm:$0xff] }
 0x4c4   : > { %1749 = vmatprep.mubr.msk.f32.mxu1 %vm1983_vm1, %v1984_v13  ;;  %1806 = vmatpush3.bf16.msra.mxu1 %v1805_v31  ;;  %v1832_v29 = vpack.c.bf16 %v1452_v28, %v1451_v27  ;;  %v1454_v31 = vld [vmem:[%s2392_s11 + $0x68] sm:$0xff] }
 0x4c5   : > { %1807 = vmatprep.subr.bf16.mxu1 %v1982_v10  ;;  %1830 = vmatpush3.bf16.msra.mxu0 %v1829_v26 }
 0x4c6   : > { %1831 = vmatprep.subr.bf16.mxu0 %v1982_v10 }
 0x4c8   : > { %1809 = vmatpush3.bf16.msra.mxu1 %v1808_v36  ;;  %v1635_v36 = vld [vmem:[%s2391_s10] ss:$0 sm:$0xff] }
 0x4c9   : > { %1810 = vmatprep.subr.bf16.mxu1 %v1982_v10  ;;  %1833 = vmatpush3.bf16.msra.mxu0 %v1832_v29 }
 0x4ca   : > { %1834 = vmatprep.subr.bf16.mxu0 %v1982_v10 }
 0x585   : > { %v719_v32 = vpop.f32.mrb[4].mxu1 }
 0x586   : > { %v1710_v33 = vpop.f32.mrb[5].mxu1 }
 0x587   : > { %v1455_v33 = vld [vmem:[%s2392_s11 + $0x70] sm:$0xff] }
 0x588   : > { %v1838_v35 = vpack.c.bf16 %v1456_v34, %v1455_v33 }
 0x58e   : > { %v885_v37 = vpop.f32.mrb[6].mxu1 }
 0x58f   : > { %1222 = vrot.lane.b32.xlu0 %v885_v37, %s1996_s15  ;;  %v1720_v38 = vpop.f32.mrb[7].mxu1 }
 0x592   : > { %v1051_v39 = vpop.f32.mrb[8].mxu1 }
 0x593   : > { %1226 = vrot.lane.b32.xlu1 %v1051_v39, %s1997_s16  ;;  %v1730_v40 = vpop.f32.mrb[9].mxu1 }
 0x596   : > { %v1217_v41 = vpop.f32.mrb[10].mxu1 }
 0x597   : > { %1230 = vrot.lane.b32.xlu0 %v1217_v41, %s1998_s20  ;;  %v1740_v42 = vpop.f32.mrb[11].mxu1  ;;  %s2338_s20 = scalar_lea.hbm %s2394_s13, %s1639_s0 }
 0x601   : > { %v1223_v43 = vpop.permute.xlu0 %1222 }
 0x602   : > { %v1233_v45 = vsel %vm560_vm2, %v719_v32, %v1223_v43  ;;  %v1835_v32 = vpack.c.bf16 %v1454_v31, %v1453_v30 }
 0x604   : > { %1836 = vmatpush3.bf16.msra.mxu0 %v1835_v32 }
 0x605   : > { %v1227_v44 = vpop.permute.xlu1 %1226  ;;  %1837 = vmatprep.subr.bf16.mxu0 %v1982_v10 }
 0x606   : > { %v1235_v46 = vsel %vm1234_vm4, %v1233_v45, %v1227_v44  ;;  %v1637_v44 = vld [vmem:[%s2393_s12] ss:$0 sm:$0xff] }
 0x608   : > { %1839 = vmatpush3.bf16.msra.mxu0 %v1838_v35 }
 0x609   : > { %v1231_v47 = vpop.permute.xlu0 %1230 }
 0x60a   : > { %v1237_v48 = vsel %vm1236_vm5, %v1235_v46, %v1231_v47 }
 0x60b   : > { %1750 = vmatmul.mubr.msk.f32.vlgmr.msra.gmra.mrb[12].mxu1 %vm439_vm0, %v1237_v48 }
 0x60c   : > { %1760 = vmatprep.mubr.msk.f32.mxu1 %vm1983_vm1, %v1984_v13 }
 0x6de   : > { %v1318_v50 = vpop.f32.mrb[12].mxu1 }
 0x6df   : > { %v1319_v51 = vadd.f32 %v1631_v49, %v1318_v50  ;;  %v1751_v52 = vpop.f32.mrb[13].mxu1 }
 0x6e1   : > { %v2245_v53 = vadd.f32 %v1319_v51, %v2123_v0  ;;  %v1353_v0 = vld [vmem:[%s2390_s9 + $0x8] sm:$0xff] }
 0x6e2   : > { %v1811_v60 = vpack.c.bf16 %v1353_v0, %v1352_v59 }
 0x6e3   : > { %v1325_v54 = vsel %vm439_vm0, %v2245_v53, 0.0 }
 0x6e4   : > { %1326 = vadd.xlane.f32.xlu1 %v1325_v54  ;;  %1812 = vmatpush3.bf16.msra.mxu1 %v1811_v60 }
 0x6e5   : > { %1813 = vmatprep.subr.bf16.mxu1 %v1982_v10 }
 0x6e8   : > { %1815 = vmatpush3.bf16.msra.mxu1 %v1814_v63 }
 0x771   : > { %v1327_v55 = vpop.xlane.xlu1 %1326 }
 0x772   : > { %v1328_v56 = vmul.f32 0.03125, %v1327_v55 }
 0x774   : > { %v1329_v57 = vsub.f32 %v2245_v53, %v1328_v56 }
 0x776   : > { %v1330_v58 = vmul.f32 %v1329_v57, %v1329_v57 }
 0x778   : > { %v1331_v13 = vsel %vm439_vm0, %v1330_v58, 0.0 }
 0x779   : > { %1332 = vadd.xlane.f32.xlu0 %v1331_v13 }
 0x806   : > { %v1333_v11 = vpop.xlane.xlu0 %1332 }
 0x807   : > { %v1334_v12 = vmul.f32 0.03125, %v1333_v11 }
 0x809   : > { %v1335_v14 = vadd.f32 1e-05, %v1334_v12 }
 0x80b   : > { %1914 = vrsqrt.f32 %v1335_v14 }
 0x815   : > { %v1915_v15 = vpop.eup %1914 }
 0x816   : > { %v1337_v17 = vmul.f32 %v1915_v15, %v1329_v57 }
 0x818   : > { %v1344_v19 = vmul.f32 %v1633_v16, %v1337_v17 }
 0x81a   : > { %v1351_v20 = vadd.f32 %v1634_v18, %v1344_v19 }
 0x81c   : > { %1761 = vmatmul.mubr.msk.f32.vlgmr.msra.gmra.mrb[14].mxu1 %vm439_vm0, %v1351_v20 }
 0x8ef   : > { %v1432_v37 = vpop.f32.mrb[14].mxu1 }
 0x8f0   : > { %v1433_v38 = vadd.f32 %v1635_v36, %v1432_v37  ;;  %v1762_v39 = vpop.f32.mrb[15].mxu1 }
 0x8f2   : > { %v1437_v10 = vmul.f32 0.70710677, %v1433_v38  ;;  %v1436_v41 = vmul.f32 0.5, %v1433_v38 }
 0x8f4   : > { %1916 = verf.f32 %v1437_v10 }
 0x8fe   : > { %v1917_v40 = vpop.eup %1916 }
 0x8ff   : > { %v1439_v42 = vadd.f32 1.0, %v1917_v40 }
 0x901   : > { %v1440_v43 = vmul.f32 %v1439_v42, %v1436_v41 }
 0x903   : > { %1796 = vmatmul.mubr.f32.vlgmr.msra.gmra.mrb[6].mxu0 %v1440_v43 }
 0x9d6   : > { %v1530_v45 = vpop.f32.mrb[6].mxu0 }
 0x9d7   : > { %v1531_v46 = vadd.f32 %v1637_v44, %v1530_v45  ;;  %v1797_v47 = vpop.f32.mrb[7].mxu0 }
 0x9d9   : > { %v1534_v48 = vadd.f32 %v1531_v46, %v2245_v53 }
 0x9db   : > { %1535 = vst.msk [vmem:[%s431_s1] sm:$0xff] %vm439_vm0, %v1534_v48 }
 0x9dc   : > { %1931 = shalt.err (!%p1928_p3)
}
 0x9dd   : > { %s1932_s21 = scalar_lea.hbm %s2338_s20, 128  ;;  %s1936_s15 = scalar_lea.hbm %s2394_s13, 256 }
 0x9de   : > { %p1933_p4 = scmp.ne.s32.totalorder %s2338_s20, %s1932_s21  ;;  %p1937_p9 = scmp.lt.u32.totalorder %s2338_s20, %s2394_s13 }
 0x9df   : > { %p1938_p10 = scmp.lt.u32.totalorder %s1936_s15, %s1932_s21  ;;  %p1940_p12 = scmp.lt.u32.totalorder %s1932_s21, %s2338_s20 }
 0x9e0   : > { %p1934_p7 = pnand %p1933_p4, %p2108_p5 }
 0x9e1   : > { %p1939_p11 = por %p1938_p10, %p1937_p9 }
 0x9e2   : > { %p1935_p8 = pneg %p1934_p7 }
 0x9e3   : > { %p1941_p13 = por %p1940_p12, %p1939_p11 }
 0x9e5   : > { %p1942_p0 = pnand %p1941_p13, %p1935_p8 }
 0x9e7   : > { %1945 = shalt.err (!%p1942_p0)
}
 0x9e8   : > { %1840 = dma.vmem_to_hbm [thread:$0]  (%p2108_p5), %s2340_s30, 128, %s2338_s20, %s1537_s23  }
 0x9e9 PF: > { %p1846_p1 = scmp.ge.s32.totalorder %s1980_s28, 2  ;;  %s1562_s2 = sand.u32 1, %s1968_s25  }
 0x9ea   : > { %s1563_s29 = scalar_lea.sflag [#allocation3], %s1562_s2 }
 0x9eb   : > { %p1843_p2 = pnand %p1846_p1, %p2112_p6 }
 0x9ed   : > { %1963 = dma.done.wait (!%p1843_p2), %s1563_s29, 128  }
 0x9ee   : > { %1965 = vsyncadd (!%p1843_p2), %s1563_s29, 4294967168  ;;  %p23_p3 = scmp.ge.s32.totalorder %s2095_s14, 4   ;;  %s2403_s25 = smov %s1972_s26 }
 0x9ef   : > { %s2404_s26 = smov %s1976_s27  ;;  %s2405_s27 = smov %s2106_s17 }
 0x9f0   : > { %s2406_s28 = smov %s2095_s14  ;;  %25 = sbr.rel (!%p23_p3) target bundleno = 7 (0x7), region = 107 }
 0x9f7   :  { %1568 = vsyncpa [#allocation3], 1 }
 0x9f8   :  { %1570 = vsyncpa [#allocation3 + $0x1], 1 }

</bundles_post_ra>
